<compile_context>
chip_gen: v6e
topology: v6e:2x2x1
jax: 0.10.0
libtpu: 0.0.40
codegen_flags: <defaults>
</compile_context>

<pallas_src>
import functools

import jax
import jax.numpy as jnp
from jax import lax
from jax.experimental import pallas as pl
from jax.experimental.pallas import tpu as pltpu


def _bilm_kernel(wid_ref, feat_ref, side_ref, out_ref, *, height, width):
    """One block = (b, H*W): b whole planes, spatially flattened (lane-dense).

    3x3 max/min pooling is done with lane rolls on the flattened planes:
      left / right neighbours -> roll by 1 / (hw-1)   (masked at W boundaries)
      up   / down  neighbours -> roll by W / (hw-W)   (masked at H boundaries)
    pltpu.roll follows jnp.roll semantics (out[i] = in[(i - shift) % n]) and
    only accepts non-negative shifts, hence the (hw - s) forms.
    """
    b, hw = out_ref.shape
    h = height
    w = width

    side = side_ref[...].astype(jnp.float32)
    sig = jax.nn.sigmoid(side)

    # Boundary masks from integer compares only (no XLU work, no int div).
    wid = jnp.broadcast_to(wid_ref[...], (b, hw))          # within-row W coord
    flat = lax.broadcasted_iota(jnp.int32, (b, hw), 1)     # flattened h*W + w
    has_l = wid > 0                   # left  neighbour exists (w >= 1)
    has_r = wid < (w - 1)             # right neighbour exists (w <= W-2)
    has_u = flat >= w                 # up    neighbour exists (h >= 1)
    has_d = flat < (h - 1) * w        # down  neighbour exists (h <= H-2)

    def shifted(x, s):
        return pltpu.roll(x, shift=s % hw, axis=1)

    # ---- W pass (3-tap along W); shifted values shared by max and min. ----
    # Missing neighbours are replaced by the centre value (neutral for both
    # the max and the min reduction).
    v_l = jnp.where(has_l, shifted(sig, 1), sig)           # value at (h, w-1)
    v_r = jnp.where(has_r, shifted(sig, hw - 1), sig)      # value at (h, w+1)
    w_max = jnp.maximum(sig, jnp.maximum(v_l, v_r))
    w_min = jnp.minimum(sig, jnp.minimum(v_l, v_r))

    # ---- H pass (3-tap along H) on the row-pooled maps. ----
    u_max = jnp.where(has_u, shifted(w_max, w), w_max)         # (h-1, w)
    d_max = jnp.where(has_d, shifted(w_max, hw - w), w_max)    # (h+1, w)
    pool_max = jnp.maximum(w_max, jnp.maximum(u_max, d_max))

    u_min = jnp.where(has_u, shifted(w_min, w), w_min)
    d_min = jnp.where(has_d, shifted(w_min, hw - w), w_min)
    pool_min = jnp.minimum(w_min, jnp.minimum(u_min, d_min))

    # maxpool(sig) + maxpool(-sig) == maxpool(sig) - minpool(sig)
    out = (pool_max - pool_min) * feat_ref[...].astype(jnp.float32) + side
    out_ref[...] = out.astype(out_ref.dtype)


def bilm_forward(feat, side_feat_map):
    """feat, side_feat_map: (N, C, H, W). Returns (N, C, H, W)."""
    assert feat.shape == side_feat_map.shape
    n, c, h, w = feat.shape
    nc = n * c
    hw = h * w
    dtype = feat.dtype

    # Lane-dense layout: flatten each (H, W) plane into the minor axis. This
    # is a free, contiguous reshape (no HBM transpose).
    feat2 = feat.reshape(nc, hw)
    side2 = side_feat_map.reshape(nc, hw)

    # Per-plane W coordinate, computed once on the host side (avoids integer
    # div/mod in the kernel). Its block index is constant, so it is fetched
    # into VMEM only once.
    wid = jnp.tile(jnp.arange(w, dtype=jnp.int32), h).reshape(1, hw)

    # ---- Block-size selection --------------------------------------------
    # Budget in 4-byte elements (all in-kernel temporaries are f32 regardless
    # of input dtype). ~2 MiB blocks keep the working set (2 inputs + 1
    # output double-buffered + ~8 f32 temporaries) well under a 48 MiB scoped
    # VMEM limit: safe on v5e/v6e (128 MiB physical) and v7x (64 MiB).
    target_block_bytes = 2 * 1024 * 1024
    f32_plane_bytes = hw * 4
    b = max(1, target_block_bytes // f32_plane_bytes)
    b = min(b, nc)
    if b < nc:
        # Second-minor block dim must be a multiple of 8 (sublane tiling) or
        # equal to the full array dim.
        b = max(8, (b // 8) * 8)
        b = min(b, nc)
    # Keep several grid steps when the plane count allows it: overlaps DMA
    # with compute and lets "parallel" shard the plane axis across both
    # TensorCores on v7x. Only cap when an 8-aligned cap exists.
    for min_steps in (4, 2):
        cap = ((nc // min_steps) // 8) * 8
        if cap >= 8:
            b = min(b, cap)
            break
    # TODO(synk): for very large planes (H*W*4 bytes beyond a few MiB), tile H
    # with a 1-row halo instead of loading whole flattened planes per block.

    grid = (pl.cdiv(nc, b),)  # ragged last block handled by Pallas (no jnp.pad)

    kernel = functools.partial(_bilm_kernel, height=h, width=w)
    out = pl.pallas_call(
        kernel,
        out_shape=jax.ShapeDtypeStruct((nc, hw), dtype),
        grid_spec=pltpu.PrefetchScalarGridSpec(
            num_scalar_prefetch=0,
            grid=grid,
            in_specs=[
                pl.BlockSpec((1, hw), lambda i: (0, 0)),   # wid (constant block)
                pl.BlockSpec((b, hw), lambda i: (i, 0)),   # feat
                pl.BlockSpec((b, hw), lambda i: (i, 0)),   # side_feat_map
            ],
            out_specs=pl.BlockSpec((b, hw), lambda i: (i, 0)),
        ),
        compiler_params=pltpu.CompilerParams(
            dimension_semantics=("parallel",),
            vmem_limit_bytes=48 * 1024 * 1024,
        ),
    )(wid, feat2, side2)

    return out.reshape(n, c, h, w)


def _bilm_reference(feat, side_feat_map):
    """Pure-JAX reference matching the PyTorch forward."""
    sig = jax.nn.sigmoid(side_feat_map)
    pos = lax.reduce_window(
        sig, -jnp.inf, lax.max, (1, 1, 3, 3), (1, 1, 1, 1),
        padding=((0, 0), (0, 0), (1, 1), (1, 1)))
    neg = lax.reduce_window(
        -sig, -jnp.inf, lax.max, (1, 1, 3, 3), (1, 1, 1, 1),
        padding=((0, 0), (0, 0), (1, 1), (1, 1)))
    return (pos + neg) * feat + side_feat_map


if __name__ == "__main__":
    key = jax.random.PRNGKey(0)
    k1, k2 = jax.random.split(key)
    N, C, H, W = 2, 4, 16, 16
    feat = jax.random.normal(k1, (N, C, H, W), dtype=jnp.float32)
    side = jax.random.normal(k2, (N, C, H, W), dtype=jnp.float32)

    out = jax.block_until_ready(bilm_forward(feat, side))

    ref = _bilm_reference(feat, side)
    if not jnp.allclose(out, ref, atol=2e-5, rtol=2e-5):
        raise AssertionError("Pallas BILM output does not match reference")

    print("KERNEL_OK")
</pallas_src>

<mosaic_0001>
module attributes {stable_mosaic.version = 11 : i64} {
  func.func @_bilm_kernel(%arg0: i32, %arg1: memref<1x256xi32, #tpu.memory_space<vmem>>, %arg2: memref<8x256xf32, #tpu.memory_space<vmem>>, %arg3: memref<8x256xf32, #tpu.memory_space<vmem>>, %arg4: memref<8x256xf32, #tpu.memory_space<vmem>>) attributes {dimension_semantics = [#tpu.dimension_semantics<parallel>], iteration_bounds = array<i64: 1>, scalar_prefetch = 0 : i64, scratch_operands = 0 : i64, tpu.core_type = #tpu.core_type<tc>, window_params = [{pipeline_mode = #tpu.pipeline_mode<synchronous>, transform_indices = @transform_0, window_bounds = array<i64: 1, 256>}, {transform_indices = @transform_1, window_bounds = array<i64: 8, 256>}, {transform_indices = @transform_2, window_bounds = array<i64: 8, 256>}, {transform_indices = @transform_3, window_bounds = array<i64: 8, 256>}]} {
    %c0 = arith.constant 0 : index
    %c0_0 = arith.constant 0 : index
    %0 = vector.load %arg3[%c0, %c0_0] : memref<8x256xf32, #tpu.memory_space<vmem>>, vector<8x256xf32>
    %1 = arith.negf %0 : vector<8x256xf32>
    %2 = math.exp %1 : vector<8x256xf32>
    %cst = arith.constant 1.000000e+00 : f32
    %3 = vector.broadcast %cst : f32 to vector<8x256xf32>
    %4 = arith.addf %3, %2 : vector<8x256xf32>
    %5 = arith.divf %3, %4 : vector<8x256xf32>
    %c0_1 = arith.constant 0 : index
    %c0_2 = arith.constant 0 : index
    %6 = vector.load %arg1[%c0_1, %c0_2] : memref<1x256xi32, #tpu.memory_space<vmem>>, vector<1x256xi32>
    %7 = vector.shape_cast %6 : vector<1x256xi32> to vector<1x256xi32>
    %8 = vector.broadcast %7 : vector<1x256xi32> to vector<8x256xi32>
    %9 = tpu.iota {dimensions = array<i32: 1>} : vector<8x256xi32>
    %c0_i32 = arith.constant 0 : i32
    %10 = vector.broadcast %c0_i32 : i32 to vector<8x256xi32>
    %11 = arith.cmpi sgt, %8, %10 : vector<8x256xi32>
    %c15_i32 = arith.constant 15 : i32
    %12 = vector.broadcast %c15_i32 : i32 to vector<8x256xi32>
    %13 = arith.cmpi slt, %8, %12 : vector<8x256xi32>
    %c16_i32 = arith.constant 16 : i32
    %14 = vector.broadcast %c16_i32 : i32 to vector<8x256xi32>
    %15 = arith.cmpi sge, %9, %14 : vector<8x256xi32>
    %c240_i32 = arith.constant 240 : i32
    %16 = vector.broadcast %c240_i32 : i32 to vector<8x256xi32>
    %17 = arith.cmpi slt, %9, %16 : vector<8x256xi32>
    %c1_i32 = arith.constant 1 : i32
    %18 = tpu.dynamic_rotate %5 by %c1_i32 dim 1 : vector<8x256xf32>, i32 -> vector<8x256xf32>
    %19 = arith.select %11, %18, %5 : vector<8x256xi1>, vector<8x256xf32>
    %c255_i32 = arith.constant 255 : i32
    %20 = tpu.dynamic_rotate %5 by %c255_i32 dim 1 : vector<8x256xf32>, i32 -> vector<8x256xf32>
    %21 = arith.select %13, %20, %5 : vector<8x256xi1>, vector<8x256xf32>
    %22 = arith.maximumf %19, %21 : vector<8x256xf32>
    %23 = arith.maximumf %5, %22 : vector<8x256xf32>
    %24 = arith.minimumf %19, %21 : vector<8x256xf32>
    %25 = arith.minimumf %5, %24 : vector<8x256xf32>
    %c16_i32_3 = arith.constant 16 : i32
    %26 = tpu.dynamic_rotate %23 by %c16_i32_3 dim 1 : vector<8x256xf32>, i32 -> vector<8x256xf32>
    %27 = arith.select %15, %26, %23 : vector<8x256xi1>, vector<8x256xf32>
    %c240_i32_4 = arith.constant 240 : i32
    %28 = tpu.dynamic_rotate %23 by %c240_i32_4 dim 1 : vector<8x256xf32>, i32 -> vector<8x256xf32>
    %29 = arith.select %17, %28, %23 : vector<8x256xi1>, vector<8x256xf32>
    %30 = arith.maximumf %27, %29 : vector<8x256xf32>
    %31 = arith.maximumf %23, %30 : vector<8x256xf32>
    %c16_i32_5 = arith.constant 16 : i32
    %32 = tpu.dynamic_rotate %25 by %c16_i32_5 dim 1 : vector<8x256xf32>, i32 -> vector<8x256xf32>
    %33 = arith.select %15, %32, %25 : vector<8x256xi1>, vector<8x256xf32>
    %c240_i32_6 = arith.constant 240 : i32
    %34 = tpu.dynamic_rotate %25 by %c240_i32_6 dim 1 : vector<8x256xf32>, i32 -> vector<8x256xf32>
    %35 = arith.select %17, %34, %25 : vector<8x256xi1>, vector<8x256xf32>
    %36 = arith.minimumf %33, %35 : vector<8x256xf32>
    %37 = arith.minimumf %25, %36 : vector<8x256xf32>
    %38 = arith.subf %31, %37 : vector<8x256xf32>
    %c0_7 = arith.constant 0 : index
    %c0_8 = arith.constant 0 : index
    %39 = vector.load %arg2[%c0_7, %c0_8] : memref<8x256xf32, #tpu.memory_space<vmem>>, vector<8x256xf32>
    %40 = arith.mulf %38, %39 : vector<8x256xf32>
    %41 = arith.addf %40, %0 : vector<8x256xf32>
    %c0_9 = arith.constant 0 : index
    %c0_10 = arith.constant 0 : index
    %42 = vector.load %arg4[%c0_9, %c0_10] : memref<8x256xf32, #tpu.memory_space<vmem>>, vector<8x256xf32>
    tpu.vector_store %arg4[%c0_9, %c0_10], %41 {strides = array<i32>} : memref<8x256xf32, #tpu.memory_space<vmem>>, vector<8x256xf32>,
    return
  }
  func.func @transform_0(%arg0: i32) -> (i32, i32) {
    %c0_i32 = arith.constant 0 : i32
    %c0_i32_0 = arith.constant 0 : i32
    %c0_i32_1 = arith.constant 0 : i32
    return %c0_i32, %c0_i32_0 : i32, i32
  }
  func.func @transform_1(%arg0: i32) -> (i32, i32) {
    %c0_i32 = arith.constant 0 : i32
    %c0_i32_0 = arith.constant 0 : i32
    return %arg0, %c0_i32 : i32, i32
  }
  func.func @transform_2(%arg0: i32) -> (i32, i32) {
    %c0_i32 = arith.constant 0 : i32
    %c0_i32_0 = arith.constant 0 : i32
    return %arg0, %c0_i32 : i32, i32
  }
  func.func @transform_3(%arg0: i32) -> (i32, i32) {
    %c0_i32 = arith.constant 0 : i32
    %c0_i32_0 = arith.constant 0 : i32
    return %arg0, %c0_i32 : i32, i32
  }
}

</mosaic_0001>

<bundles_post_ra>
// kernel: tpu_custom_call.1
= control target key start
LH: loop header
LB: loop body
LE: loop exit
PB: predicated region body
PF: predicated region fallthrough
CT: control target
= control target key end

     0   :  { %8 = vsyncpa [#allocation3], 0  ;;  %s356_s0 = inlined_call_operand.hbm [shape: s32[1,256], index: 0, kind: input, shape index: {}]   ;;  %s357_s1 = inlined_call_operand.hbm [shape: f32[8,256], index: 1, kind: input, shape index: {}]   ;;  %s358_s2 = inlined_call_operand.hbm [shape: f32[8,256], index: 2, kind: input, shape index: {}]   ;;  %s359_s3 = inlined_call_operand.hbm [shape: f32[8,256], index: 3, kind: output, shape index: {}]  }
   0x1   :  { %9 = vsyncpa [#allocation6], 0 }
   0x2   :  { %10 = vsyncpa [#allocation4], 0  ;;  %s282_s12 = smov [#allocation5]   ;;  %s283_s14 = smov [#allocation2]  }
   0x3   :  { %s27_s13 = sshll.u32 %s282_s12, 4  ;;  %s17_s15 = sshll.u32 %s283_s14, 4  ;;  %s28_s13 = int_to_ptr.vmem [resolvable:$true] %s27_s13  ;;  %s18_s15 = int_to_ptr.vmem [resolvable:$true] %s17_s15 }
   0x4   :  { %s204_s16 = scalar_lea.vmem %s28_s13, 256  ;;  %p209_p1 = scmp.lt.s32.totalorder %s28_s13, %s28_s13 }
   0x5   :  { %p205_p0 = scmp.ne.s32.totalorder %s28_s13, %s204_s16  ;;  %p210_p2 = scmp.lt.s32.totalorder %s204_s16, %s204_s16 }
   0x7   :  { %p211_p3 = por %p210_p2, %p209_p1 }
   0x9   :  { %p212_p4 = pnand %p211_p3, %p205_p0 }
   0xb   :  { %215 = shalt.err (!%p212_p4)
}
   0xc   :  { %30 = dma.hbm_to_vmem [thread:$0]  %s357_s1, 256, %s28_s13, [#allocation6]  }
   0xd   :  { %s224_s19 = scalar_lea.vmem %s18_s15, 32  ;;  %p229_p6 = scmp.lt.s32.totalorder %s18_s15, %s18_s15 }
   0xe   :  { %p225_p5 = scmp.ne.s32.totalorder %s18_s15, %s224_s19  ;;  %p230_p7 = scmp.lt.s32.totalorder %s224_s19, %s224_s19 }
  0x10   :  { %p231_p8 = por %p230_p7, %p229_p6 }
  0x12   :  { %p232_p9 = pnand %p231_p8, %p225_p5 }
  0x14   :  { %235 = shalt.err (!%p232_p9)
}
  0x15   :  { %20 = dma.hbm_to_vmem [thread:$0]  %s356_s0, 32, %s18_s15, [#allocation3]  }
  0x16   :  { %s284_s22 = smov [#allocation7]  }
  0x17   :  { %s37_s23 = sshll.u32 %s284_s22, 4  ;;  %s38_s23 = int_to_ptr.vmem [resolvable:$true] %s37_s23 }
  0x18   :  { %s244_s24 = scalar_lea.vmem %s38_s23, 256  ;;  %p249_p11 = scmp.lt.s32.totalorder %s38_s23, %s38_s23 }
  0x19   :  { %p245_p10 = scmp.ne.s32.totalorder %s38_s23, %s244_s24  ;;  %p250_p12 = scmp.lt.s32.totalorder %s244_s24, %s244_s24 }
  0x1b   :  { %p251_p13 = por %p250_p12, %p249_p11 }
  0x1d   :  { %p252_p0 = pnand %p251_p13, %p245_p10 }
  0x1f   :  { %255 = shalt.err (!%p252_p0)
}
  0x20   :  { %40 = dma.hbm_to_vmem [thread:$0]  %s358_s2, 256, %s38_s23, [#allocation6]  }
  0x21   :  { %276 = dma.done.wait [#allocation3], 32  }
  0x22   :  { %277 = vsyncadd [#allocation3], 4294967264 }
  0x23   :  { %278 = dma.done.wait [#allocation6], 512  }
  0x24   :  { %279 = vsyncadd [#allocation6], 4294966784  ;;  %v319_v0 = vld [vmem:[#allocation7] sm:$0xff]  ;;  %v321_v1 = vld [vmem:[#allocation7 + $0x8] sm:$0xff]  ;;  %s285_s0 = smov 127   ;;  %s286_s2 = smov 1   ;;  %v65_v10 = vlaneseq }
  0x25   :  { %v178_v2 = vmul.f32 -1.442695, %v319_v0  ;;  %v179_v3 = vmul.f32 -1.442695, %v321_v1  ;;  %v64_v14 = vld [vmem:[#allocation2] sm:$0x3] }
  0x26   :  { %v66_v11 = vshrl.u32 %v65_v10, 7  ;;  %v325_v15 = vand.u32 127, %v65_v10  ;;  %s287_s26 = smov 16   ;;  %s288_s27 = smov 112  }
  0x27   :  { %188 = vpow2.f32 %v178_v2  ;;  %s289_s28 = smov [#allocation8]  }
  0x28   :  { %190 = vpow2.f32 %v179_v3  ;;  %v67_v12 = vsub.s32 0, %v66_v11  ;;  %v71_v13 = vsub.s32 1, %v66_v11  ;;  %vm97_vm0 = vcmp.lt.s32.totalorder %v325_v15, 127  ;;  %s168_s29 = sshll.u32 %s289_s28, 4  ;;  %s169_s29 = int_to_ptr.vmem [resolvable:$true] %s168_s29 }
  0x29   :  { %vm88_vm1 = vcmp.lt.s32.totalorder %v325_v15, 1  ;;  %v75_v40 = vadd.s32 128, %v325_v15  ;;  %vm123_vm6 = vcmp.lt.s32.totalorder %v325_v15, 112  ;;  %vm114_vm7 = vcmp.lt.s32.totalorder %v325_v15, 16  ;;  %s256_s30 = scalar_lea.vmem %s169_s29, 256  ;;  %p261_p2 = scmp.lt.s32.totalorder %s169_s29, %s169_s29 }
  0x2a   :  { %v68_v16 = vrot.slane %v64_v14, %v67_v12  ;;  %v72_v17 = vrot.slane %v64_v14, %v71_v13  ;;  %vm80_vm9 = vcmp.ge.s32.totalorder %v325_v15, 16  ;;  %p257_p1 = scmp.ne.s32.totalorder %s169_s29, %s256_s30  ;;  %p262_p3 = scmp.lt.s32.totalorder %s256_s30, %s256_s30 }
  0x2b   :  { %vm83_vm8 = vcmp.lt.s32.totalorder %v75_v40, 240 }
  0x2c   :  { %vm78_vm2 = vcmp.lt.s32.totalorder %v68_v16, 15  ;;  %vm79_vm3 = vcmp.lt.s32.totalorder %v72_v17, 15  ;;  %vm76_vm4 = vcmp.gt.s32.totalorder %v68_v16, 0  ;;  %vm77_vm5 = vcmp.gt.s32.totalorder %v72_v17, 0  ;;  %p263_p4 = por %p262_p3, %p261_p2 }
  0x2e   :  { %p264_p5 = pnand %p263_p4, %p257_p1 }
  0x34   :  { %v189_v4 = vpop.eup %188 }
  0x35   :  { %v191_v5 = vpop.eup %190  ;;  %v58_v6 = vadd.f32 1.0, %v189_v4 }
  0x36   :  { %v59_v7 = vadd.f32 1.0, %v191_v5  ;;  %v154_v5 = vld [vmem:[#allocation5] sm:$0xff] }
  0x37   :  { %192 = vrcp.f32 %v58_v6 }
  0x38   :  { %194 = vrcp.f32 %v59_v7  ;;  %v155_v7 = vld [vmem:[#allocation5 + $0x8] sm:$0xff] }
  0x44   :  { %v193_v8 = vpop.eup %192 }
  0x45   :  { %93 = vrot.lane.b32.xlu1 %v193_v8, %s285_s0  ;;  %84 = vrot.lane.b32.xlu0 %v193_v8, %s286_s2  ;;  %v195_v9 = vpop.eup %194 }
  0x49   :  { %95 = vrot.lane.b32.xlu1 %v195_v9, %s285_s0  ;;  %86 = vrot.lane.b32.xlu0 %v195_v9, %s286_s2 }
  0xb7   :  { %v94_v18 = vpop.permute.xlu1 %93  ;;  %v85_v19 = vpop.permute.xlu0 %84 }
  0xbb   :  { %v96_v20 = vpop.permute.xlu1 %95  ;;  %v87_v21 = vpop.permute.xlu0 %86 }
  0xbc   :  { %v98_v22 = vsel %vm97_vm0, %v94_v18, %v96_v20  ;;  %v99_v23 = vsel %vm97_vm0, %v96_v20, %v94_v18  ;;  %v89_v24 = vsel %vm88_vm1, %v85_v19, %v87_v21  ;;  %v90_v25 = vsel %vm88_vm1, %v87_v21, %v85_v19 }
  0xbd   :  { %v100_v26 = vsel %vm78_vm2, %v98_v22, %v193_v8  ;;  %v101_v27 = vsel %vm79_vm3, %v99_v23, %v195_v9  ;;  %v91_v28 = vsel %vm76_vm4, %v90_v25, %v193_v8  ;;  %v92_v29 = vsel %vm77_vm5, %v89_v24, %v195_v9 }
  0xbe   :  { %v102_v30 = vmax.f32 %v91_v28, %v100_v26  ;;  %v103_v31 = vmax.f32 %v92_v29, %v101_v27  ;;  %v106_v34 = vmin.f32 %v91_v28, %v100_v26  ;;  %v107_v35 = vmin.f32 %v92_v29, %v101_v27 }
  0xc0   :  { %v104_v32 = vmax.f32 %v193_v8, %v102_v30  ;;  %v105_v33 = vmax.f32 %v195_v9, %v103_v31  ;;  %v108_v36 = vmin.f32 %v193_v8, %v106_v34  ;;  %v109_v37 = vmin.f32 %v195_v9, %v107_v35 }
  0xc2   :  { %110 = vrot.lane.b32.xlu0 %v104_v32, %s287_s26  ;;  %112 = vrot.lane.b32.xlu1 %v105_v33, %s287_s26 }
  0xc6   :  { %119 = vrot.lane.b32.xlu0 %v104_v32, %s288_s27  ;;  %121 = vrot.lane.b32.xlu1 %v105_v33, %s288_s27 }
  0xca   :  { %132 = vrot.lane.b32.xlu0 %v108_v36, %s287_s26  ;;  %134 = vrot.lane.b32.xlu1 %v109_v37, %s287_s26 }
  0xce   :  { %140 = vrot.lane.b32.xlu0 %v108_v36, %s288_s27  ;;  %142 = vrot.lane.b32.xlu1 %v109_v37, %s288_s27 }
 0x134   :  { %v111_v38 = vpop.permute.xlu0 %110  ;;  %v113_v39 = vpop.permute.xlu1 %112 }
 0x135   :  { %v116_v44 = vsel %vm114_vm7, %v113_v39, %v111_v38  ;;  %v115_v51 = vsel %vm114_vm7, %v111_v38, %v113_v39 }
 0x136   :  { %v117_v50 = vsel %vm80_vm9, %v116_v44, %v104_v32 }
 0x138   :  { %v120_v41 = vpop.permute.xlu0 %119  ;;  %v122_v42 = vpop.permute.xlu1 %121 }
 0x139   :  { %v125_v43 = vsel %vm123_vm6, %v122_v42, %v120_v41  ;;  %v124_v47 = vsel %vm123_vm6, %v120_v41, %v122_v42 }
 0x13a   :  { %v127_v48 = vsel %vm83_vm8, %v125_v43, %v105_v33  ;;  %v128_v52 = vmax.f32 %v117_v50, %v124_v47 }
 0x13b   :  { %v129_v55 = vmax.f32 %v115_v51, %v127_v48 }
 0x13c   :  { %v133_v45 = vpop.permute.xlu0 %132  ;;  %v135_v46 = vpop.permute.xlu1 %134  ;;  %v130_v63 = vmax.f32 %v104_v32, %v128_v52 }
 0x13d   :  { %v137_v49 = vsel %vm114_vm7, %v135_v46, %v133_v45  ;;  %v136_v59 = vsel %vm114_vm7, %v133_v45, %v135_v46  ;;  %v131_v3 = vmax.f32 %v105_v33, %v129_v55 }
 0x13e   :  { %v138_v56 = vsel %vm80_vm9, %v137_v49, %v108_v36 }
 0x140   :  { %v141_v53 = vpop.permute.xlu0 %140  ;;  %v143_v54 = vpop.permute.xlu1 %142 }
 0x141   :  { %v144_v57 = vsel %vm123_vm6, %v141_v53, %v143_v54  ;;  %v145_v58 = vsel %vm123_vm6, %v143_v54, %v141_v53 }
 0x142   :  { %v147_v60 = vsel %vm83_vm8, %v145_v58, %v109_v37  ;;  %v148_v61 = vmin.f32 %v138_v56, %v144_v57 }
 0x143   :  { %v149_v62 = vmin.f32 %v136_v59, %v147_v60 }
 0x144   :  { %v150_v2 = vmin.f32 %v108_v36, %v148_v61 }
 0x145   :  { %v151_v4 = vmin.f32 %v109_v37, %v149_v62 }
 0x146   :  { %v152_v6 = vsub.f32 %v130_v63, %v150_v2 }
 0x147   :  { %v153_v8 = vsub.f32 %v131_v3, %v151_v4 }
 0x148   :  { %v156_v9 = vmul.f32 %v154_v5, %v152_v6 }
 0x149   :  { %v157_v10 = vmul.f32 %v155_v7, %v153_v8 }
 0x14a   :  { %v158_v11 = vadd.f32 %v156_v9, %v319_v0 }
 0x14b   :  { %v159_v12 = vadd.f32 %v157_v10, %v321_v1 }
 0x14c   :  { %160 = vst [vmem:[#allocation8] sm:$0xff] %v158_v11 }
 0x14d   :  { %161 = vst [vmem:[#allocation8 + $0x8] sm:$0xff] %v159_v12 }
 0x14e   :  { %267 = shalt.err (!%p264_p5)
}
 0x14f   :  { %171 = dma.vmem_to_hbm [thread:$0]  %s169_s29, 256, %s359_s3, [#allocation4]  }
 0x150   :  { %280 = dma.done.wait [#allocation4], 256  }
 0x151   :  { %281 = vsyncadd [#allocation4], 4294967040 }
 0x152   :  { %175 = vsyncpa [#allocation3], 1 }
 0x153   :  { %176 = vsyncpa [#allocation6], 1 }
 0x154   :  { %177 = vsyncpa [#allocation4], 1 }

</bundles_post_ra>
